<compile_context>
chip_gen: v5e
topology: v5e:2x2
jax: 0.10.0
libtpu: 0.0.40
codegen_flags: <defaults>
</compile_context>

<pallas_src>
import functools

import jax
import jax.numpy as jnp
from jax import lax
from jax.experimental import pallas as pl
from jax.experimental.pallas import tpu as pltpu

_LANES = 128
_MAX_BLOCK_ROWS = 4096      # (4096,128) f32 block = 2 MiB per mel input
_NUM_CORE_SPLITS = 2        # leading "parallel" axis; sharded across TCs on v7x


def _cdiv(a, b):
    return -(-a // b)


def _round_up(x, m):
    return _cdiv(x, m) * m


def _as_rows(x):
    """Lane-dense (rows, 128) view. Copy-free when x.size % 128 == 0."""
    flat = x.reshape(-1)
    n = flat.shape[0]
    rows = _cdiv(n, _LANES)
    padded = rows * _LANES
    if padded != n:
        # TODO(synk): lane-unaligned sizes still pay one (minimal) padded HBM
        # copy; tiling the natural N-D shape would avoid it but complicates
        # block selection. Padding is exact for all four loss terms.
        flat = jnp.pad(flat, (0, padded - n))
    return flat.reshape(rows, _LANES)


def _mel_tiling(rows):
    """Pick (splits, kblocks, block_rows) covering `rows` with no fully-OOB block."""
    if rows <= _MAX_BLOCK_ROWS:
        return 1, 1, rows                                  # single full-extent block
    splits = _NUM_CORE_SPLITS
    kblocks = max(1, _cdiv(rows, splits * _MAX_BLOCK_ROWS))
    total = splits * kblocks
    block_rows = _round_up(_cdiv(rows, total), 8)
    if (total - 1) * block_rows >= rows:                   # never create a fully-OOB block
        splits = 1
        block_rows = _MAX_BLOCK_ROWS
        kblocks = _cdiv(rows, block_rows)
    return splits, kblocks, block_rows


def _fused_loss_kernel(mel_p_ref, mel_t_ref,
                       dur_p_ref, dur_t_ref,
                       en_p_ref, en_t_ref,
                       pi_p_ref, pi_t_ref,
                       out_ref,
                       *, kblocks, block_rows, rows_valid,
                       inv_n_mel, inv_n_pred, needs_mask):
    c = pl.program_id(0)      # core-split axis ("parallel")
    k = pl.program_id(1)      # streaming/reduction axis ("arbitrary")

    # Mel squared error for this block (VALU work, overlapped with next DMA).
    d = mel_p_ref[...].astype(jnp.float32) - mel_t_ref[...].astype(jnp.float32)
    sq = d * d
    if needs_mask:
        start = (c * kblocks + k) * block_rows
        row = lax.broadcasted_iota(jnp.int32, sq.shape, 0) + start
        sq = jnp.where(row < rows_valid, sq, 0.0)

    partial = jnp.sum(sq, axis=0, keepdims=True)            # (1, 128)

    @pl.when(k == 0)
    def _():
        out_ref[0] = partial          # first visit writes (no zero-init + add)

    @pl.when(k > 0)
    def _():
        out_ref[0] += partial

    # Finalize once per split: fold lanes + tiny predictor losses.
    @pl.when(k == kblocks - 1)
    def _():
        mel_partial = jnp.sum(out_ref[0]) * inv_n_mel        # this split's share

        def _log_mse(p_ref, t_ref):
            p = p_ref[...].astype(jnp.float32)
            t = jnp.log(t_ref[...].astype(jnp.float32) + 1.0)
            dd = p - t
            return jnp.sum(dd * dd) * inv_n_pred

        dur_loss = _log_mse(dur_p_ref, dur_t_ref)
        en_loss = _log_mse(en_p_ref, en_t_ref)
        pi_loss = _log_mse(pi_p_ref, pi_t_ref)

        lane = lax.broadcasted_iota(jnp.int32, (1, _LANES), 1)
        blk = jnp.where(lane == 0, mel_partial,
              jnp.where(lane == 1, dur_loss,
              jnp.where(lane == 2, en_loss,
              jnp.where(lane == 3, pi_loss, 0.0))))
        out_ref[0] = blk


def fastspeech_loss(
    mel_output,
    duration_predictor_output,
    pitch_predictor_output,
    energy_predictor_output,
    mel_target,
    length_target,
    energy_target,
    pitch_target,
):
    n_mel = mel_output.size
    n_pred = duration_predictor_output.size

    mel_p = _as_rows(mel_output)
    mel_t = _as_rows(mel_target)
    rows = mel_p.shape[0]

    dur_p = _as_rows(duration_predictor_output)
    dur_t = _as_rows(length_target)
    en_p = _as_rows(energy_predictor_output)
    en_t = _as_rows(energy_target)
    pi_p = _as_rows(pitch_predictor_output)
    pi_t = _as_rows(pitch_target)
    pred_rows = dur_p.shape[0]

    splits, kblocks, block_rows = _mel_tiling(rows)
    needs_mask = (splits * kblocks * block_rows) != rows

    mel_spec = pl.BlockSpec((block_rows, _LANES), lambda c, k: (c * kblocks + k, 0))
    # Tiny predictor tensors stay VMEM-resident (constant index_map -> fetched once).
    # TODO(synk): pipeline_mode=pl.Buffered(1) would halve their small VMEM
    # footprint; kept at default buffering for robustness.
    pred_spec = pl.BlockSpec((pred_rows, _LANES), lambda c, k: (0, 0))
    out_spec = pl.BlockSpec((1, 1, _LANES), lambda c, k: (c, 0, 0))

    kernel = functools.partial(
        _fused_loss_kernel,
        kblocks=kblocks,
        block_rows=block_rows,
        rows_valid=rows,
        inv_n_mel=1.0 / float(n_mel),
        inv_n_pred=1.0 / float(n_pred),
        needs_mask=needs_mask,
    )

    bytes_accessed = sum(
        int(a.size) * int(a.dtype.itemsize)
        for a in (mel_p, mel_t, dur_p, dur_t, en_p, en_t, pi_p, pi_t)
    ) + splits * _LANES * 4
    cost = pl.CostEstimate(
        flops=3 * int(n_mel) + 12 * int(n_pred),
        transcendentals=3 * int(n_pred),
        bytes_accessed=int(bytes_accessed),
    )

    out = pl.pallas_call(
        kernel,
        out_shape=jax.ShapeDtypeStruct((splits, 1, _LANES), jnp.float32),
        grid=(splits, kblocks),
        in_specs=[
            mel_spec, mel_spec,                    # mel pred / target (streamed)
            pred_spec, pred_spec,                  # duration pred / target
            pred_spec, pred_spec,                  # energy pred / target
            pred_spec, pred_spec,                  # pitch pred / target
        ],
        out_specs=out_spec,
        compiler_params=pltpu.CompilerParams(
            dimension_semantics=("parallel", "arbitrary"),
            vmem_limit_bytes=32 * 1024 * 1024,
        ),
        cost_estimate=cost,
    )(mel_p, mel_t, dur_p, dur_t, en_p, en_t, pi_p, pi_t)

    mel_loss = jnp.sum(out[:, 0, 0])       # sum per-split partial mel MSEs
    duration_loss = out[0, 0, 1]
    energy_loss = out[0, 0, 2]
    pitch_loss = out[0, 0, 3]
    return mel_loss, duration_loss, energy_loss, pitch_loss


def _reference(mel_output, dur_out, pitch_out, energy_out,
               mel_target, length_target, energy_target, pitch_target):
    mel_loss = jnp.mean((mel_output - mel_target) ** 2)
    dur_loss = jnp.mean(
        (dur_out - jnp.log((length_target + 1).astype(jnp.float32))) ** 2
    )
    energy_loss = jnp.mean((energy_out - jnp.log(energy_target + 1.0)) ** 2)
    pitch_loss = jnp.mean((pitch_out - jnp.log(pitch_target + 1.0)) ** 2)
    return mel_loss, dur_loss, energy_loss, pitch_loss


if __name__ == "__main__":
    B, T, N_MELS = 2, 8, 32
    key = jax.random.PRNGKey(0)
    ks = jax.random.split(key, 8)

    mel_output = jax.random.normal(ks[0], (B, T, N_MELS), dtype=jnp.float32)
    mel_target = jax.random.normal(ks[1], (B, T, N_MELS), dtype=jnp.float32)

    duration_predictor_output = jax.random.normal(ks[2], (B, T), dtype=jnp.float32)
    pitch_predictor_output = jax.random.normal(ks[3], (B, T), dtype=jnp.float32)
    energy_predictor_output = jax.random.normal(ks[4], (B, T), dtype=jnp.float32)

    length_target = jax.random.randint(ks[5], (B, T), 0, 10, dtype=jnp.int32)
    energy_target = jax.random.uniform(ks[6], (B, T), dtype=jnp.float32) * 5.0
    pitch_target = jax.random.uniform(ks[7], (B, T), dtype=jnp.float32) * 5.0

    losses = fastspeech_loss(
        mel_output,
        duration_predictor_output,
        pitch_predictor_output,
        energy_predictor_output,
        mel_target,
        length_target,
        energy_target,
        pitch_target,
    )
    losses = jax.block_until_ready(losses)

    ref = _reference(
        mel_output,
        duration_predictor_output,
        pitch_predictor_output,
        energy_predictor_output,
        mel_target,
        length_target,
        energy_target,
        pitch_target,
    )

    for got, want in zip(losses, ref):
        assert jnp.allclose(got, want, rtol=1e-5, atol=1e-5), (got, want)

    print("KERNEL_OK")
</pallas_src>

<mosaic_0001>
module attributes {stable_mosaic.version = 11 : i64} {
  func.func @_fused_loss_kernel(%arg0: i32, %arg1: i32, %arg2: memref<4x128xf32, #tpu.memory_space<vmem>>, %arg3: memref<4x128xf32, #tpu.memory_space<vmem>>, %arg4: memref<1x128xf32, #tpu.memory_space<vmem>>, %arg5: memref<1x128xi32, #tpu.memory_space<vmem>>, %arg6: memref<1x128xf32, #tpu.memory_space<vmem>>, %arg7: memref<1x128xf32, #tpu.memory_space<vmem>>, %arg8: memref<1x128xf32, #tpu.memory_space<vmem>>, %arg9: memref<1x128xf32, #tpu.memory_space<vmem>>, %arg10: memref<1x1x128xf32, #tpu.memory_space<vmem>>) attributes {dimension_semantics = [#tpu.dimension_semantics<parallel>, #tpu.dimension_semantics<arbitrary>], iteration_bounds = array<i64: 1, 1>, scalar_prefetch = 0 : i64, scratch_operands = 0 : i64, tpu.core_type = #tpu.core_type<tc>, window_params = [{transform_indices = @transform_0, window_bounds = array<i64: 4, 128>}, {transform_indices = @transform_1, window_bounds = array<i64: 4, 128>}, {pipeline_mode = #tpu.pipeline_mode<synchronous>, transform_indices = @transform_2, window_bounds = array<i64: 1, 128>}, {pipeline_mode = #tpu.pipeline_mode<synchronous>, transform_indices = @transform_3, window_bounds = array<i64: 1, 128>}, {pipeline_mode = #tpu.pipeline_mode<synchronous>, transform_indices = @transform_4, window_bounds = array<i64: 1, 128>}, {pipeline_mode = #tpu.pipeline_mode<synchronous>, transform_indices = @transform_5, window_bounds = array<i64: 1, 128>}, {pipeline_mode = #tpu.pipeline_mode<synchronous>, transform_indices = @transform_6, window_bounds = array<i64: 1, 128>}, {pipeline_mode = #tpu.pipeline_mode<synchronous>, transform_indices = @transform_7, window_bounds = array<i64: 1, 128>}, {transform_indices = @transform_8, window_bounds = array<i64: 1, 1, 128>}]} {
    %c0 = arith.constant 0 : index
    %c0_0 = arith.constant 0 : index
    %0 = vector.load %arg2[%c0, %c0_0] : memref<4x128xf32, #tpu.memory_space<vmem>>, vector<4x128xf32>
    %c0_1 = arith.constant 0 : index
    %c0_2 = arith.constant 0 : index
    %1 = vector.load %arg3[%c0_1, %c0_2] : memref<4x128xf32, #tpu.memory_space<vmem>>, vector<4x128xf32>
    %2 = arith.subf %0, %1 : vector<4x128xf32>
    %3 = arith.mulf %2, %2 : vector<4x128xf32>
    %cst = arith.constant dense<0.000000e+00> : vector<128xf32>
    %4 = vector.multi_reduction <add>, %3, %cst [0] : vector<4x128xf32> to vector<128xf32>
    %5 = vector.shape_cast %4 : vector<128xf32> to vector<1x128xf32>
    %c0_i32 = arith.constant 0 : i32
    %6 = arith.cmpi eq, %arg1, %c0_i32 : i32
    %7 = arith.extui %6 : i1 to i32
    %c0_i32_3 = arith.constant 0 : i32
    %8 = arith.cmpi ne, %7, %c0_i32_3 : i32
    scf.if %8 {
      %c0_8 = arith.constant 0 : index
      %c0_9 = arith.constant 0 : index
      %c0_10 = arith.constant 0 : index
      %15 = vector.load %arg10[%c0_8, %c0_9, %c0_10] : memref<1x1x128xf32, #tpu.memory_space<vmem>>, vector<1x1x128xf32>
      %16 = vector.shape_cast %15 : vector<1x1x128xf32> to vector<1x128xf32>
      %17 = vector.shape_cast %5 : vector<1x128xf32> to vector<1x1x128xf32>
      tpu.vector_store %arg10[%c0_8, %c0_9, %c0_10], %17 {strides = array<i32>} : memref<1x1x128xf32, #tpu.memory_space<vmem>>, vector<1x1x128xf32>,
    } else {
    }
    %c0_i32_4 = arith.constant 0 : i32
    %9 = arith.cmpi sgt, %arg1, %c0_i32_4 : i32
    %10 = arith.extui %9 : i1 to i32
    %c0_i32_5 = arith.constant 0 : i32
    %11 = arith.cmpi ne, %10, %c0_i32_5 : i32
    scf.if %11 {
      %c0_8 = arith.constant 0 : index
      %c0_9 = arith.constant 0 : index
      %c0_10 = arith.constant 0 : index
      %15 = vector.load %arg10[%c0_8, %c0_9, %c0_10] : memref<1x1x128xf32, #tpu.memory_space<vmem>>, vector<1x1x128xf32>
      %16 = vector.shape_cast %15 : vector<1x1x128xf32> to vector<1x128xf32>
      %17 = arith.addf %16, %5 : vector<1x128xf32>
      %c0_11 = arith.constant 0 : index
      %c0_12 = arith.constant 0 : index
      %c0_13 = arith.constant 0 : index
      %18 = vector.load %arg10[%c0_11, %c0_12, %c0_13] : memref<1x1x128xf32, #tpu.memory_space<vmem>>, vector<1x1x128xf32>
      %19 = vector.shape_cast %18 : vector<1x1x128xf32> to vector<1x128xf32>
      %20 = vector.shape_cast %17 : vector<1x128xf32> to vector<1x1x128xf32>
      tpu.vector_store %arg10[%c0_11, %c0_12, %c0_13], %20 {strides = array<i32>} : memref<1x1x128xf32, #tpu.memory_space<vmem>>, vector<1x1x128xf32>,
    } else {
    }
    %c0_i32_6 = arith.constant 0 : i32
    %12 = arith.cmpi eq, %arg1, %c0_i32_6 : i32
    %13 = arith.extui %12 : i1 to i32
    %c0_i32_7 = arith.constant 0 : i32
    %14 = arith.cmpi ne, %13, %c0_i32_7 : i32
    scf.if %14 {
      %c0_8 = arith.constant 0 : index
      %c0_9 = arith.constant 0 : index
      %c0_10 = arith.constant 0 : index
      %15 = vector.load %arg10[%c0_8, %c0_9, %c0_10] : memref<1x1x128xf32, #tpu.memory_space<vmem>>, vector<1x1x128xf32>
      %16 = vector.shape_cast %15 : vector<1x1x128xf32> to vector<1x128xf32>
      %17 = vector.shape_cast %16 : vector<1x128xf32> to vector<1x1x128xf32>
      %cst_11 = arith.constant dense<0.000000e+00> : vector<1xf32>
      %18 = vector.multi_reduction <add>, %17, %cst_11 [1, 2] : vector<1x1x128xf32> to vector<1xf32>
      %19 = vector.shape_cast %18 : vector<1xf32> to vector<1x1x1xf32>
      %20 = vector.extract %19[0, 0, 0] : f32 from vector<1x1x1xf32>
      %cst_12 = arith.constant 0.001953125 : f32
      %21 = arith.mulf %20, %cst_12 : f32
      %c0_13 = arith.constant 0 : index
      %c0_14 = arith.constant 0 : index
      %22 = vector.load %arg4[%c0_13, %c0_14] : memref<1x128xf32, #tpu.memory_space<vmem>>, vector<1x128xf32>
      %c0_15 = arith.constant 0 : index
      %c0_16 = arith.constant 0 : index
      %23 = vector.load %arg5[%c0_15, %c0_16] : memref<1x128xi32, #tpu.memory_space<vmem>>, vector<1x128xi32>
      %24 = arith.sitofp %23 : vector<1x128xi32> to vector<1x128xf32>
      %cst_17 = arith.constant 1.000000e+00 : f32
      %25 = vector.broadcast %cst_17 : f32 to vector<1x128xf32>
      %26 = arith.addf %24, %25 : vector<1x128xf32>
      %27 = math.log %26 : vector<1x128xf32>
      %28 = arith.subf %22, %27 : vector<1x128xf32>
      %29 = arith.mulf %28, %28 : vector<1x128xf32>
      %30 = vector.shape_cast %29 : vector<1x128xf32> to vector<1x1x128xf32>
      %cst_18 = arith.constant dense<0.000000e+00> : vector<1xf32>
      %31 = vector.multi_reduction <add>, %30, %cst_18 [1, 2] : vector<1x1x128xf32> to vector<1xf32>
      %32 = vector.shape_cast %31 : vector<1xf32> to vector<1x1x1xf32>
      %33 = vector.extract %32[0, 0, 0] : f32 from vector<1x1x1xf32>
      %cst_19 = arith.constant 6.250000e-02 : f32
      %34 = arith.mulf %33, %cst_19 : f32
      %c0_20 = arith.constant 0 : index
      %c0_21 = arith.constant 0 : index
      %35 = vector.load %arg6[%c0_20, %c0_21] : memref<1x128xf32, #tpu.memory_space<vmem>>, vector<1x128xf32>
      %c0_22 = arith.constant 0 : index
      %c0_23 = arith.constant 0 : index
      %36 = vector.load %arg7[%c0_22, %c0_23] : memref<1x128xf32, #tpu.memory_space<vmem>>, vector<1x128xf32>
      %cst_24 = arith.constant 1.000000e+00 : f32
      %37 = vector.broadcast %cst_24 : f32 to vector<1x128xf32>
      %38 = arith.addf %36, %37 : vector<1x128xf32>
      %39 = math.log %38 : vector<1x128xf32>
      %40 = arith.subf %35, %39 : vector<1x128xf32>
      %41 = arith.mulf %40, %40 : vector<1x128xf32>
      %42 = vector.shape_cast %41 : vector<1x128xf32> to vector<1x1x128xf32>
      %cst_25 = arith.constant dense<0.000000e+00> : vector<1xf32>
      %43 = vector.multi_reduction <add>, %42, %cst_25 [1, 2] : vector<1x1x128xf32> to vector<1xf32>
      %44 = vector.shape_cast %43 : vector<1xf32> to vector<1x1x1xf32>
      %45 = vector.extract %44[0, 0, 0] : f32 from vector<1x1x1xf32>
      %cst_26 = arith.constant 6.250000e-02 : f32
      %46 = arith.mulf %45, %cst_26 : f32
      %c0_27 = arith.constant 0 : index
      %c0_28 = arith.constant 0 : index
      %47 = vector.load %arg8[%c0_27, %c0_28] : memref<1x128xf32, #tpu.memory_space<vmem>>, vector<1x128xf32>
      %c0_29 = arith.constant 0 : index
      %c0_30 = arith.constant 0 : index
      %48 = vector.load %arg9[%c0_29, %c0_30] : memref<1x128xf32, #tpu.memory_space<vmem>>, vector<1x128xf32>
      %cst_31 = arith.constant 1.000000e+00 : f32
      %49 = vector.broadcast %cst_31 : f32 to vector<1x128xf32>
      %50 = arith.addf %48, %49 : vector<1x128xf32>
      %51 = math.log %50 : vector<1x128xf32>
      %52 = arith.subf %47, %51 : vector<1x128xf32>
      %53 = arith.mulf %52, %52 : vector<1x128xf32>
      %54 = vector.shape_cast %53 : vector<1x128xf32> to vector<1x1x128xf32>
      %cst_32 = arith.constant dense<0.000000e+00> : vector<1xf32>
      %55 = vector.multi_reduction <add>, %54, %cst_32 [1, 2] : vector<1x1x128xf32> to vector<1xf32>
      %56 = vector.shape_cast %55 : vector<1xf32> to vector<1x1x1xf32>
      %57 = vector.extract %56[0, 0, 0] : f32 from vector<1x1x1xf32>
      %cst_33 = arith.constant 6.250000e-02 : f32
      %58 = arith.mulf %57, %cst_33 : f32
      %59 = tpu.iota {dimensions = array<i32: 1>} : vector<1x128xi32>
      %c0_i32_34 = arith.constant 0 : i32
      %60 = vector.broadcast %c0_i32_34 : i32 to vector<1x128xi32>
      %61 = arith.cmpi eq, %59, %60 : vector<1x128xi32>
      %c1_i32 = arith.constant 1 : i32
      %62 = vector.broadcast %c1_i32 : i32 to vector<1x128xi32>
      %63 = arith.cmpi eq, %59, %62 : vector<1x128xi32>
      %c2_i32 = arith.constant 2 : i32
      %64 = vector.broadcast %c2_i32 : i32 to vector<1x128xi32>
      %65 = arith.cmpi eq, %59, %64 : vector<1x128xi32>
      %c3_i32 = arith.constant 3 : i32
      %66 = vector.broadcast %c3_i32 : i32 to vector<1x128xi32>
      %67 = arith.cmpi eq, %59, %66 : vector<1x128xi32>
      %cst_35 = arith.constant 0.000000e+00 : f32
      %68 = vector.broadcast %58 : f32 to vector<1x128xf32>
      %69 = vector.broadcast %cst_35 : f32 to vector<1x128xf32>
      %70 = arith.select %67, %68, %69 : vector<1x128xi1>, vector<1x128xf32>
      %71 = vector.broadcast %46 : f32 to vector<1x128xf32>
      %72 = arith.select %65, %71, %70 : vector<1x128xi1>, vector<1x128xf32>
      %73 = vector.broadcast %34 : f32 to vector<1x128xf32>
      %74 = arith.select %63, %73, %72 : vector<1x128xi1>, vector<1x128xf32>
      %75 = vector.broadcast %21 : f32 to vector<1x128xf32>
      %76 = arith.select %61, %75, %74 : vector<1x128xi1>, vector<1x128xf32>
      %c0_36 = arith.constant 0 : index
      %c0_37 = arith.constant 0 : index
      %c0_38 = arith.constant 0 : index
      %77 = vector.load %arg10[%c0_36, %c0_37, %c0_38] : memref<1x1x128xf32, #tpu.memory_space<vmem>>, vector<1x1x128xf32>
      %78 = vector.shape_cast %77 : vector<1x1x128xf32> to vector<1x128xf32>
      %79 = vector.shape_cast %76 : vector<1x128xf32> to vector<1x1x128xf32>
      tpu.vector_store %arg10[%c0_36, %c0_37, %c0_38], %79 {strides = array<i32>} : memref<1x1x128xf32, #tpu.memory_space<vmem>>, vector<1x1x128xf32>,
    } else {
    }
    return
  }
  func.func @transform_0(%arg0: i32, %arg1: i32) -> (i32, i32) {
    %c1_i32 = arith.constant 1 : i32
    %0 = arith.muli %arg0, %c1_i32 : i32
    %1 = arith.addi %0, %arg1 : i32
    %c0_i32 = arith.constant 0 : i32
    %c0_i32_0 = arith.constant 0 : i32
    return %1, %c0_i32 : i32, i32
  }
  func.func @transform_1(%arg0: i32, %arg1: i32) -> (i32, i32) {
    %c1_i32 = arith.constant 1 : i32
    %0 = arith.muli %arg0, %c1_i32 : i32
    %1 = arith.addi %0, %arg1 : i32
    %c0_i32 = arith.constant 0 : i32
    %c0_i32_0 = arith.constant 0 : i32
    return %1, %c0_i32 : i32, i32
  }
  func.func @transform_2(%arg0: i32, %arg1: i32) -> (i32, i32) {
    %c0_i32 = arith.constant 0 : i32
    %c0_i32_0 = arith.constant 0 : i32
    %c0_i32_1 = arith.constant 0 : i32
    return %c0_i32, %c0_i32_0 : i32, i32
  }
  func.func @transform_3(%arg0: i32, %arg1: i32) -> (i32, i32) {
    %c0_i32 = arith.constant 0 : i32
    %c0_i32_0 = arith.constant 0 : i32
    %c0_i32_1 = arith.constant 0 : i32
    return %c0_i32, %c0_i32_0 : i32, i32
  }
  func.func @transform_4(%arg0: i32, %arg1: i32) -> (i32, i32) {
    %c0_i32 = arith.constant 0 : i32
    %c0_i32_0 = arith.constant 0 : i32
    %c0_i32_1 = arith.constant 0 : i32
    return %c0_i32, %c0_i32_0 : i32, i32
  }
  func.func @transform_5(%arg0: i32, %arg1: i32) -> (i32, i32) {
    %c0_i32 = arith.constant 0 : i32
    %c0_i32_0 = arith.constant 0 : i32
    %c0_i32_1 = arith.constant 0 : i32
    return %c0_i32, %c0_i32_0 : i32, i32
  }
  func.func @transform_6(%arg0: i32, %arg1: i32) -> (i32, i32) {
    %c0_i32 = arith.constant 0 : i32
    %c0_i32_0 = arith.constant 0 : i32
    %c0_i32_1 = arith.constant 0 : i32
    return %c0_i32, %c0_i32_0 : i32, i32
  }
  func.func @transform_7(%arg0: i32, %arg1: i32) -> (i32, i32) {
    %c0_i32 = arith.constant 0 : i32
    %c0_i32_0 = arith.constant 0 : i32
    %c0_i32_1 = arith.constant 0 : i32
    return %c0_i32, %c0_i32_0 : i32, i32
  }
  func.func @transform_8(%arg0: i32, %arg1: i32) -> (i32, i32, i32) {
    %c0_i32 = arith.constant 0 : i32
    %c0_i32_0 = arith.constant 0 : i32
    %c0_i32_1 = arith.constant 0 : i32
    return %arg0, %c0_i32, %c0_i32_0 : i32, i32, i32
  }
}

</mosaic_0001>

<bundles_post_ra>
// kernel: tpu_custom_call.1
= control target key start
LH: loop header
LB: loop body
LE: loop exit
PB: predicated region body
PF: predicated region fallthrough
CT: control target
= control target key end

     0   :  { %13 = vsyncpa [#allocation3], 0  ;;  %s368_s0 = inlined_call_operand.hbm [shape: f32[4,128], index: 0, kind: input, shape index: {}]   ;;  %s369_s1 = inlined_call_operand.hbm [shape: f32[4,128], index: 1, kind: input, shape index: {}]   ;;  %s370_s2 = inlined_call_operand.vmem [shape: f32[1,128], index: 2, kind: input, shape index: {}]   ;;  %s371_s3 = inlined_call_operand.vmem [shape: s32[1,128], index: 3, kind: input, shape index: {}]   ;;  %s372_s4 = inlined_call_operand.vmem [shape: f32[1,128], index: 4, kind: input, shape index: {}]   ;;  %s373_s5 = inlined_call_operand.vmem [shape: f32[1,128], index: 5, kind: input, shape index: {}]   ;;  %s374_s6 = inlined_call_operand.vmem [shape: f32[1,128], index: 6, kind: input, shape index: {}]   ;;  %s375_s7 = inlined_call_operand.vmem [shape: f32[1,128], index: 7, kind: input, shape index: {}]   ;;  %s376_s8 = inlined_call_operand.hbm [shape: f32[1,1,128], index: 8, kind: output, shape index: {}]  }
   0x1   :  { %14 = vsyncpa [#allocation6], 0 }
   0x2   :  { %15 = vsyncpa [#allocation4], 0  ;;  %s24_s29 = sshll.u32 %s368_s0, 4  ;;  %s289_s30 = smov [#allocation2]   ;;  %s25_s29 = int_to_ptr.hbm [resolvable:$true] %s24_s29 }
   0x3   :  { %s26_s9 = sshll.u32 %s289_s30, 4  ;;  %s38_s12 = sshll.u32 %s369_s1, 4  ;;  %s27_s9 = int_to_ptr.vmem [resolvable:$true] %s26_s9  ;;  %s39_s12 = int_to_ptr.hbm [resolvable:$true] %s38_s12 }
   0x4   :  { %29 = dma.hbm_to_vmem [thread:$0]  %s25_s29, 64, %s27_s9, [#allocation3]  }
   0x5   :  { %s290_s13 = smov [#allocation5]  }
   0x6   :  { %s40_s14 = sshll.u32 %s290_s13, 4  ;;  %s41_s14 = int_to_ptr.vmem [resolvable:$true] %s40_s14 }
   0x7   :  { %43 = dma.hbm_to_vmem [thread:$0]  %s39_s12, 64, %s41_s14, [#allocation6]  }
   0x8   :  { %283 = dma.done.wait [#allocation3], 64  }
   0x9   :  { %284 = vsyncadd [#allocation3], 4294967232 }
   0xa   :  { %285 = dma.done.wait [#allocation6], 64  }
   0xb   :  { %286 = vsyncadd [#allocation6], 4294967232  ;;  %v126_v0 = vld [vmem:[%s373_s5] sm:$0x1]  ;;  %v67_v3 = vld [vmem:[#allocation5] sm:$0xf] }
   0xc   :  { %v66_v1 = vld [vmem:[#allocation2] sm:$0xf]  ;;  %v127_v2 = vadd.f32 1.0, %v126_v0  ;;  %vm70_vm0 = vcmask 1043456   ;;  %vm94_vm1 = vcmask 1040384   ;;  %s291_s27 = smov [#allocation7]  }
   0xd   :  { %v68_v4 = vsub.f32 %v66_v1, %v67_v3  ;;  %v144_v5 = vld [vmem:[%s375_s7] sm:$0x1]  ;;  %s181_s28 = sshll.u32 %s291_s27, 4  ;;  %s183_s9 = sshll.u32 %s376_s8, 4  ;;  %s182_s28 = int_to_ptr.vmem [resolvable:$true] %s181_s28  ;;  %s184_s9 = int_to_ptr.hbm [resolvable:$true] %s183_s9 }
   0xe   :  { %v107_v6 = vld [vmem:[%s371_s3] sm:$0x1]  ;;  %205 = vlog2.f32 %v127_v2  ;;  %v145_v7 = vadd.f32 1.0, %v144_v5  ;;  %v161_v2 = vlaneseq }
   0xf   :  { %v69_v8 = vmul.f32 %v68_v4, %v68_v4  ;;  %v108_v9 = vcvt.s32.f32 %v107_v6  ;;  %v125_v14 = vld [vmem:[%s372_s4] sm:$0x1] }
  0x10   :  { %207 = vlog2.f32 %v145_v7  ;;  %v143_v19 = vld [vmem:[%s374_s6] sm:$0x1]  ;;  %v162_v3 = vand.u32 127, %v161_v2 }
  0x11   :  { %v71_v10 = vsel %vm70_vm0, %v69_v8, 0.0  ;;  %v109_v12 = vadd.f32 1.0, %v108_v9  ;;  %v106_v32 = vld [vmem:[%s370_s2] sm:$0x1] }
  0x12   :  { %v72_v11 = vrot.slane %v71_v10, 4  ;;  %vm166_vm2 = vcmp.eq.s32.totalorder %v162_v3, 3  ;;  %vm165_vm3 = vcmp.eq.s32.totalorder %v162_v3, 2  ;;  %vm164_vm4 = vcmp.eq.s32.totalorder %v162_v3, 1 }
  0x13   :  { %209 = vlog2.f32 %v109_v12  ;;  %vm163_vm5 = vcmp.eq.s32.totalorder %v162_v3, 0 }
  0x14   :  { %v206_v13 = vpop.eup %205  ;;  %v73_v15 = vadd.f32 %v72_v11, %v71_v10 }
  0x15   :  { %v129_v16 = vmul.f32 0.6931472, %v206_v13 }
  0x16   :  { %v208_v17 = vpop.eup %207  ;;  %v74_v18 = vrot.slane %v73_v15, 2 }
  0x17   :  { %v130_v20 = vsub.f32 %v125_v14, %v129_v16  ;;  %v147_v21 = vmul.f32 0.6931472, %v208_v17 }
  0x18   :  { %v75_v22 = vadd.f32 %v74_v18, %v73_v15 }
  0x19   :  { %v131_v23 = vmul.f32 %v130_v20, %v130_v20  ;;  %v148_v24 = vsub.f32 %v143_v19, %v147_v21  ;;  %v210_v28 = vpop.eup %209 }
  0x1a   :  { %v76_v25 = vrot.slane %v75_v22, 1  ;;  %v111_v30 = vmul.f32 0.6931472, %v210_v28 }
  0x1b   :  { %v132_v26 = vsel %vm94_vm1, %v131_v23, 0.0  ;;  %v149_v29 = vmul.f32 %v148_v24, %v148_v24 }
  0x1c   :  { %133 = vadd.xlane.f32.xlu1 %v132_v26  ;;  %v77_v27 = vadd.f32 %v76_v25, %v75_v22  ;;  %v112_v33 = vsub.f32 %v106_v32, %v111_v30 }
  0x1d   :  { %v150_v31 = vsel %vm94_vm1, %v149_v29, 0.0 }
  0x1e   :  { %82 = vst [vmem:[#allocation7] sm:$0x1] %v77_v27  ;;  %v113_v36 = vmul.f32 %v112_v33, %v112_v33 }
  0x20   :  { %v114_v37 = vsel %vm94_vm1, %v113_v36, 0.0 }
  0x24   :  { %151 = vadd.xlane.f32.xlu1 %v150_v31 }
  0x25   :  { %v93_v34 = vld [vmem:[#allocation7] sm:$0x1] }
  0x26   :  { %v95_v35 = vsel %vm94_vm1, %v93_v34, 0.0 }
  0x27   :  { %96 = vadd.xlane.f32.xlu0 %v95_v35 }
  0x2f   :  { %115 = vadd.xlane.f32.xlu0 %v114_v37 }
  0x8f   :  { %v134_v38 = vpop.xlane.xlu1 %133 }
  0x90   :  { %v135_v40 = vrot.slane %v134_v38, 4 }
  0x92   :  { %v136_v45 = vadd.f32 %v135_v40, %v134_v38 }
  0x94   :  { %v137_v49 = vrot.slane %v136_v45, 2 }
  0x96   :  { %v138_v56 = vadd.f32 %v137_v49, %v136_v45 }
  0x97   :  { %v152_v39 = vpop.xlane.xlu1 %151 }
  0x98   :  { %v153_v43 = vrot.slane %v152_v39, 4  ;;  %v139_v60 = vrot.slane %v138_v56, 1 }
  0x9a   :  { %v97_v41 = vpop.xlane.xlu0 %96  ;;  %v154_v47 = vadd.f32 %v153_v43, %v152_v39  ;;  %v140_v0 = vadd.f32 %v139_v60, %v138_v56 }
  0x9b   :  { %v98_v42 = vrot.slane %v97_v41, 4 }
  0x9c   :  { %v155_v51 = vrot.slane %v154_v47, 2 }
  0x9d   :  { %v99_v44 = vadd.f32 %v98_v42, %v97_v41 }
  0x9e   :  { %v156_v57 = vadd.f32 %v155_v51, %v154_v47 }
  0x9f   :  { %v100_v46 = vrot.slane %v99_v44, 2 }
  0xa0   :  { %v157_v62 = vrot.slane %v156_v57, 1 }
  0xa1   :  { %v101_v48 = vadd.f32 %v100_v46, %v99_v44 }
  0xa2   :  { %v116_v50 = vpop.xlane.xlu0 %115  ;;  %v158_v1 = vadd.f32 %v157_v62, %v156_v57 }
  0xa3   :  { %v117_v52 = vrot.slane %v116_v50, 4  ;;  %v102_v53 = vrot.slane %v101_v48, 1 }
  0xa5   :  { %v118_v54 = vadd.f32 %v117_v52, %v116_v50  ;;  %v103_v55 = vadd.f32 %v102_v53, %v101_v48 }
  0xa7   :  { %v119_v58 = vrot.slane %v118_v54, 2  ;;  %194 = vpush %v103_v55 }
  0xa9   :  { %v120_v59 = vadd.f32 %v119_v58, %v118_v54 }
  0xab   :  { %v121_v61 = vrot.slane %v120_v59, 1 }
  0xad   :  { %v122_v63 = vadd.f32 %v121_v61, %v120_v59 }
  0xaf   :  { %196 = vpush %v122_v63 }
  0xb0   :  { %198 = vpush %v140_v0 }
  0xb1   :  { %200 = vpush %v158_v1 }
  0xd8   :  { %s195_s2 = spop %194 }
  0xd9   :  { %s105_s26 = smul.f32 0.001953125, %s195_s2 }
  0xdb   :  { %v173_v9 = vstv %s105_s26 }
  0xe0   :  { %s197_s20 = spop %196 }
  0xe1   :  { %s124_s21 = smul.f32 0.0625, %s197_s20  ;;  %s199_s22 = spop %198 }
  0xe2   :  { %s142_s23 = smul.f32 0.0625, %s199_s22  ;;  %s201_s24 = spop %200 }
  0xe3   :  { %s160_s25 = smul.f32 0.0625, %s201_s24  ;;  %v171_v7 = vstv %s124_s21 }
  0xe4   :  { %v169_v4 = vstv %s142_s23 }
  0xe5   :  { %v167_v5 = vstv %s160_s25 }
  0xe6   :  { %v168_v6 = vsel %vm166_vm2, %v167_v5, 0.0 }
  0xe7   :  { %v170_v8 = vsel %vm165_vm3, %v169_v4, %v168_v6 }
  0xe8   :  { %v172_v10 = vsel %vm164_vm4, %v171_v7, %v170_v8 }
  0xe9   :  { %v174_v11 = vsel %vm163_vm5, %v173_v9, %v172_v10 }
  0xea   :  { %175 = vst [vmem:[#allocation7] sm:$0x1] %v174_v11 }
  0xeb   :  { %186 = dma.vmem_to_hbm [thread:$0]  %s182_s28, 16, %s184_s9, [#allocation4]  }
  0xec   :  { %287 = dma.done.wait [#allocation4], 16  }
  0xed   :  { %288 = vsyncadd [#allocation4], 4294967280 }
  0xee   :  { %191 = vsyncpa [#allocation3], 1 }
  0xef   :  { %192 = vsyncpa [#allocation6], 1 }
  0xf0   :  { %193 = vsyncpa [#allocation4], 1 }

</bundles_post_ra>
